<compile_context>
chip_gen: v5e
topology: v5e:2x2
jax: 0.10.0
libtpu: 0.0.40
codegen_flags: <defaults>
</compile_context>

<pallas_src>
import functools
import math

import jax
import jax.numpy as jnp
from jax import lax
from jax.experimental import pallas as pl
from jax.experimental.pallas import tpu as pltpu

n_embed = 64
n_layer = 4
dropout_rate = 0.0  # p=0.0 -> dropout is a no-op


def _xavier_uniform(key, shape, gain):
    # shape = (out_features, in_features), matching torch.nn.Linear.weight
    fan_out, fan_in = shape
    limit = gain * math.sqrt(6.0 / (fan_in + fan_out))
    return jax.random.uniform(key, shape, minval=-limit, maxval=limit,
                              dtype=jnp.float32)


def ffn_kernel(x_ref, w1_ref, b1_ref, w2_ref, b2_ref, o_ref, *, chunk, unroll):
    # x_ref : (tm, E)  f32    (streams per grid step; cast to bf16 in-kernel)
    # w1_ref: (E, 4E)  bf16   (VMEM-resident, constant index_map)
    # b1_ref: (1, 4E)  f32
    # w2_ref: (4E, E)  bf16   (VMEM-resident)
    # b2_ref: (1, E)   f32
    # o_ref : (tm, E)  f32
    w1 = w1_ref[...]
    b1 = b1_ref[...]
    w2 = w2_ref[...]
    b2 = b2_ref[...]

    tm = x_ref.shape[0]
    n_chunks = tm // chunk

    def body(c, carry):
        r = pl.multiple_of(c * chunk, chunk)
        # In-kernel bf16 cast (VPU has slack); x is read from HBM once as f32.
        xc = x_ref[pl.ds(r, chunk), :].astype(w1.dtype)
        # GEMM1: bf16 x bf16 -> f32 accumulation on the MXU; bias add in f32.
        h = jnp.dot(xc, w1, preferred_element_type=jnp.float32) + b1
        # SquaredReLU in f32: relu(h)^2
        h = jnp.square(jnp.maximum(h, 0.0))
        # GEMM2: cast activation to bf16, accumulate in f32, add bias in f32.
        out = jnp.dot(h.astype(w2.dtype), w2,
                      preferred_element_type=jnp.float32) + b2
        # Dropout(p=0.0) is the identity.
        o_ref[pl.ds(r, chunk), :] = out.astype(o_ref.dtype)
        return carry

    # Moderate unroll: keeps LLO scheduling visibility without spilling vregs
    # (the live (chunk, 4E) f32 intermediate is ~32 vregs at chunk=128).
    lax.fori_loop(0, n_chunks, body, 0, unroll=unroll)


def prepare_params(w1_t, b1, w2_t, b2):
    """One-time parameter prep: bf16 weights for the MXU, f32 (1, N) biases."""
    return (w1_t.astype(jnp.bfloat16),
            b1.reshape(1, -1).astype(jnp.float32),
            w2_t.astype(jnp.bfloat16),
            b2.reshape(1, -1).astype(jnp.float32))


def feed_forward(x, w1_bf16, b1r, w2_bf16, b2r, *, tm=2048):
    """x: (B, T, n_embed) float32.  Returns (B, T, n_embed) float32."""
    B, T, E = x.shape
    H = w1_bf16.shape[1]
    M = B * T

    def _round_up(v, m):
        return ((v + m - 1) // m) * m

    # Row-tile selection:
    #   * large tiles (default 2048 rows) amortize the ~0.35us per-grid-step cost
    #   * for mid-size M, cap at ~ceil(M/2) so there are >=2 grid steps for v7x's
    #     two TensorCores (dimension_semantics=("parallel",))
    #   * tiny M: single full-array block (block dim == array dim is always legal)
    tm_target = _round_up(max(128, min(tm, 4096)), 128)
    if M <= 128:
        tm_eff = M
        chunk = M
    else:
        if M <= 2 * tm_target:
            tm_eff = _round_up(pl.cdiv(M, 2), 128)
        else:
            tm_eff = tm_target
        chunk = 128
    n_blocks = pl.cdiv(M, tm_eff)
    n_chunks = max(1, tm_eff // chunk)
    unroll = min(4, n_chunks)

    # No explicit padding: Pallas masks the partial last block (OOB reads are
    # padded, OOB writes dropped); there is no cross-row reduction so pad rows
    # cannot contaminate valid rows.
    x2d = x.reshape(M, E)

    out2d = pl.pallas_call(
        functools.partial(ffn_kernel, chunk=chunk, unroll=unroll),
        out_shape=jax.ShapeDtypeStruct((M, E), jnp.float32),
        grid_spec=pltpu.PrefetchScalarGridSpec(
            num_scalar_prefetch=0,
            grid=(n_blocks,),
            in_specs=[
                pl.BlockSpec((tm_eff, E), lambda i: (i, 0)),  # x tile (streams)
                pl.BlockSpec((E, H), lambda i: (0, 0)),       # W1^T, resident
                pl.BlockSpec((1, H), lambda i: (0, 0)),       # b1,   resident
                pl.BlockSpec((H, E), lambda i: (0, 0)),       # W2^T, resident
                pl.BlockSpec((1, E), lambda i: (0, 0)),       # b2,   resident
            ],
            out_specs=pl.BlockSpec((tm_eff, E), lambda i: (i, 0)),
        ),
        compiler_params=pltpu.CompilerParams(
            dimension_semantics=("parallel",),
            vmem_limit_bytes=16 * 1024 * 1024,
        ),
    )(x2d, w1_bf16, b1r, w2_bf16, b2r)

    return out2d.reshape(B, T, E).astype(x.dtype)


def _reference(x, w1_t, b1, w2_t, b2):
    # Pure-JAX f32 reference of the PyTorch forward pass.
    h = jnp.square(jnp.maximum(x @ w1_t + b1, 0.0))
    return h @ w2_t + b2


if __name__ == "__main__":
    key = jax.random.PRNGKey(0)
    k_x, k_w1, k_b1, k_w2, k_b2, k_x2 = jax.random.split(key, 6)

    B, T = 2, 8
    hidden = 4 * n_embed

    # Deterministic parameter init mirroring the PyTorch __init__:
    # xavier_uniform(gain=1/sqrt(2)) then scaled by (9*n_layer)^(-1/4).
    scale = (9.0 * n_layer) ** (-0.25)
    gain = 1.0 / math.sqrt(2.0)
    w1 = scale * _xavier_uniform(k_w1, (hidden, n_embed), gain)   # (out, in)
    w2 = scale * _xavier_uniform(k_w2, (n_embed, hidden), gain)   # (out, in)
    # nn.Linear bias default init: U(-1/sqrt(fan_in), 1/sqrt(fan_in))
    b1 = jax.random.uniform(k_b1, (hidden,), minval=-1.0 / math.sqrt(n_embed),
                            maxval=1.0 / math.sqrt(n_embed), dtype=jnp.float32)
    b2 = jax.random.uniform(k_b2, (n_embed,), minval=-1.0 / math.sqrt(hidden),
                            maxval=1.0 / math.sqrt(hidden), dtype=jnp.float32)

    # Pre-transpose weights to (in, out) for the kernel's row-major matmul, and
    # do the one-time bf16 cast / bias reshape here (not per call).
    w1_t = jnp.asarray(w1.T)
    w2_t = jnp.asarray(w2.T)
    w1_bf16, b1r, w2_bf16, b2r = prepare_params(w1_t, b1, w2_t, b2)

    # --- small shape consistent with the module: (B, T, n_embed) ---
    x = jax.random.normal(k_x, (B, T, n_embed), dtype=jnp.float32)
    out = jax.block_until_ready(feed_forward(x, w1_bf16, b1r, w2_bf16, b2r))
    ref = _reference(x, w1_t, b1, w2_t, b2)
    assert out.shape == (B, T, n_embed)
    # bf16 matmul inputs with f32 accumulation -> relaxed tolerance vs f32 ref.
    assert jnp.allclose(out, ref, atol=2e-2, rtol=2e-2), (
        float(jnp.max(jnp.abs(out - ref))))

    # --- second call: multi-step grid + partial (non-divisible) last block ---
    B2, T2 = 2, 300                      # M = 600 -> tm_eff=384, grid=2, partial block
    x2 = jax.random.normal(k_x2, (B2, T2, n_embed), dtype=jnp.float32)
    out2 = jax.block_until_ready(feed_forward(x2, w1_bf16, b1r, w2_bf16, b2r))
    ref2 = _reference(x2, w1_t, b1, w2_t, b2)
    assert out2.shape == (B2, T2, n_embed)
    assert jnp.allclose(out2, ref2, atol=2e-2, rtol=2e-2), (
        float(jnp.max(jnp.abs(out2 - ref2))))

    print("KERNEL_OK")
</pallas_src>

<mosaic_0001>
module attributes {stable_mosaic.version = 11 : i64} {
  func.func @ffn_kernel(%arg0: i32, %arg1: memref<16x64xf32, #tpu.memory_space<vmem>>, %arg2: memref<64x256xbf16, #tpu.memory_space<vmem>>, %arg3: memref<1x256xf32, #tpu.memory_space<vmem>>, %arg4: memref<256x64xbf16, #tpu.memory_space<vmem>>, %arg5: memref<1x64xf32, #tpu.memory_space<vmem>>, %arg6: memref<16x64xf32, #tpu.memory_space<vmem>>) attributes {dimension_semantics = [#tpu.dimension_semantics<parallel>], iteration_bounds = array<i64: 1>, scalar_prefetch = 0 : i64, scratch_operands = 0 : i64, tpu.core_type = #tpu.core_type<tc>, window_params = [{transform_indices = @transform_0, window_bounds = array<i64: 16, 64>}, {pipeline_mode = #tpu.pipeline_mode<synchronous>, transform_indices = @transform_1, window_bounds = array<i64: 64, 256>}, {pipeline_mode = #tpu.pipeline_mode<synchronous>, transform_indices = @transform_2, window_bounds = array<i64: 1, 256>}, {pipeline_mode = #tpu.pipeline_mode<synchronous>, transform_indices = @transform_3, window_bounds = array<i64: 256, 64>}, {pipeline_mode = #tpu.pipeline_mode<synchronous>, transform_indices = @transform_4, window_bounds = array<i64: 1, 64>}, {transform_indices = @transform_5, window_bounds = array<i64: 16, 64>}]} {
    %c0 = arith.constant 0 : index
    %c0_0 = arith.constant 0 : index
    %0 = vector.load %arg2[%c0, %c0_0] : memref<64x256xbf16, #tpu.memory_space<vmem>>, vector<64x256xbf16>
    %c0_1 = arith.constant 0 : index
    %c0_2 = arith.constant 0 : index
    %1 = vector.load %arg3[%c0_1, %c0_2] : memref<1x256xf32, #tpu.memory_space<vmem>>, vector<1x256xf32>
    %c0_3 = arith.constant 0 : index
    %c0_4 = arith.constant 0 : index
    %2 = vector.load %arg4[%c0_3, %c0_4] : memref<256x64xbf16, #tpu.memory_space<vmem>>, vector<256x64xbf16>
    %c0_5 = arith.constant 0 : index
    %c0_6 = arith.constant 0 : index
    %3 = vector.load %arg5[%c0_5, %c0_6] : memref<1x64xf32, #tpu.memory_space<vmem>>, vector<1x64xf32>
    %c0_i32 = arith.constant 0 : i32
    %c16_i32 = arith.constant 16 : i32
    %4 = arith.muli %c0_i32, %c16_i32 : i32
    %5 = tpu.assume_multiple %4, 16 : i32
    %6 = arith.index_cast %5 : i32 to index
    %c0_7 = arith.constant 0 : index
    %7 = vector.load %arg1[%6, %c0_7] : memref<16x64xf32, #tpu.memory_space<vmem>>, vector<16x64xf32>
    %8 = arith.truncf %7 : vector<16x64xf32> to vector<16x64xbf16>
    %cst = arith.constant dense<0.000000e+00> : vector<16x256xf32>
    %9 = tpu.matmul %8, %0, %cst {dimension_numbers = #tpu.dot_dimension_numbers<[1], [0], [0], [1], [0, 0, 1, 1], [], []>} : vector<16x64xbf16>, vector<64x256xbf16>, vector<16x256xf32> -> vector<16x256xf32>
    %10 = vector.broadcast %1 : vector<1x256xf32> to vector<16x256xf32>
    %11 = arith.addf %9, %10 : vector<16x256xf32>
    %cst_8 = arith.constant 0.000000e+00 : f32
    %12 = vector.broadcast %cst_8 : f32 to vector<16x256xf32>
    %13 = arith.maximumf %11, %12 : vector<16x256xf32>
    %14 = arith.mulf %13, %13 : vector<16x256xf32>
    %15 = arith.truncf %14 : vector<16x256xf32> to vector<16x256xbf16>
    %cst_9 = arith.constant dense<0.000000e+00> : vector<16x64xf32>
    %16 = tpu.matmul %15, %2, %cst_9 {dimension_numbers = #tpu.dot_dimension_numbers<[1], [0], [0], [1], [0, 0, 1, 1], [], []>} : vector<16x256xbf16>, vector<256x64xbf16>, vector<16x64xf32> -> vector<16x64xf32>
    %17 = vector.broadcast %3 : vector<1x64xf32> to vector<16x64xf32>
    %18 = arith.addf %16, %17 : vector<16x64xf32>
    %19 = arith.index_cast %5 : i32 to index
    %c0_10 = arith.constant 0 : index
    %20 = vector.load %arg6[%19, %c0_10] : memref<16x64xf32, #tpu.memory_space<vmem>>, vector<16x64xf32>
    tpu.vector_store %arg6[%19, %c0_10], %18 {strides = array<i32>} : memref<16x64xf32, #tpu.memory_space<vmem>>, vector<16x64xf32>,
    %c1_i32 = arith.constant 1 : i32
    return
  }
  func.func @transform_0(%arg0: i32) -> (i32, i32) {
    %c0_i32 = arith.constant 0 : i32
    %c0_i32_0 = arith.constant 0 : i32
    return %arg0, %c0_i32 : i32, i32
  }
  func.func @transform_1(%arg0: i32) -> (i32, i32) {
    %c0_i32 = arith.constant 0 : i32
    %c0_i32_0 = arith.constant 0 : i32
    %c0_i32_1 = arith.constant 0 : i32
    return %c0_i32, %c0_i32_0 : i32, i32
  }
  func.func @transform_2(%arg0: i32) -> (i32, i32) {
    %c0_i32 = arith.constant 0 : i32
    %c0_i32_0 = arith.constant 0 : i32
    %c0_i32_1 = arith.constant 0 : i32
    return %c0_i32, %c0_i32_0 : i32, i32
  }
  func.func @transform_3(%arg0: i32) -> (i32, i32) {
    %c0_i32 = arith.constant 0 : i32
    %c0_i32_0 = arith.constant 0 : i32
    %c0_i32_1 = arith.constant 0 : i32
    return %c0_i32, %c0_i32_0 : i32, i32
  }
  func.func @transform_4(%arg0: i32) -> (i32, i32) {
    %c0_i32 = arith.constant 0 : i32
    %c0_i32_0 = arith.constant 0 : i32
    %c0_i32_1 = arith.constant 0 : i32
    return %c0_i32, %c0_i32_0 : i32, i32
  }
  func.func @transform_5(%arg0: i32) -> (i32, i32) {
    %c0_i32 = arith.constant 0 : i32
    %c0_i32_0 = arith.constant 0 : i32
    return %arg0, %c0_i32 : i32, i32
  }
}

</mosaic_0001>

<bundles_post_ra>
// kernel: tpu_custom_call.1
= control target key start
LH: loop header
LB: loop body
LE: loop exit
PB: predicated region body
PF: predicated region fallthrough
CT: control target
= control target key end

     0   :  { %s601_s0 = inlined_call_operand.vmem [shape: f32[16,64], index: 0, kind: input, shape index: {}]   ;;  %s602_s1 = inlined_call_operand.vmem [shape: bf16[64,256], index: 1, kind: input, shape index: {}]   ;;  %s603_s2 = inlined_call_operand.vmem [shape: f32[1,256], index: 2, kind: input, shape index: {}]   ;;  %s604_s3 = inlined_call_operand.vmem [shape: bf16[256,64], index: 3, kind: input, shape index: {}]   ;;  %s605_s4 = inlined_call_operand.vmem [shape: f32[1,64], index: 4, kind: input, shape index: {}]   ;;  %s606_s5 = inlined_call_operand.hbm [shape: f32[16,64], index: 5, kind: output, shape index: {}]  }
   0x1   :  { %v327_v0 = vld [vmem:[%s602_s1 + $0x30] sm:$0xf]  ;;  %v406_v1 = vld [vmem:[%s602_s1 + $0x34] sm:$0xf0]  ;;  %v405_v2 = vld [vmem:[%s602_s1 + $0x34] sm:$0xf] }
   0x2   :  { %v328_v3 = vor.u32 %v406_v1, %v327_v0  ;;  %v329_v4 = vld [vmem:[%s602_s1 + $0x38] sm:$0xf0]  ;;  %v319_v5 = vld [vmem:[%s602_s1 + $0x20] sm:$0xf]  ;;  %v404_v6 = vld [vmem:[%s602_s1 + $0x24] sm:$0xf0] }
   0x3   :  { %v332_v7 = vor.u32 %v405_v2, %v329_v4  ;;  %v403_v8 = vld [vmem:[%s602_s1 + $0x24] sm:$0xf]  ;;  %v321_v9 = vld [vmem:[%s602_s1 + $0x28] sm:$0xf0]  ;;  %v320_v10 = vor.u32 %v404_v6, %v319_v5  ;;  %v311_v12 = vld [vmem:[%s602_s1 + $0x10] sm:$0xf] }
   0x4   :  { %120 = vmatpush.bf16.msra.mxu0 %v328_v3  ;;  %v324_v11 = vor.u32 %v403_v8, %v321_v9  ;;  %v402_v13 = vld [vmem:[%s602_s1 + $0x14] sm:$0xf0]  ;;  %v401_v14 = vld [vmem:[%s602_s1 + $0x14] sm:$0xf]  ;;  %v313_v15 = vld [vmem:[%s602_s1 + $0x18] sm:$0xf0] }
   0x5   :  { %134 = vmatpush.bf16.msra.mxu1 %v332_v7  ;;  %v414_v16 = vld [vmem:[%s604_s3 + $0x38] sm:$0xff]  ;;  %v312_v18 = vor.u32 %v402_v13, %v311_v12  ;;  %v303_v19 = vld [vmem:[%s602_s1] sm:$0xf]  ;;  %v400_v20 = vld [vmem:[%s602_s1 + $0x4] sm:$0xf0]  ;;  %v316_v21 = vor.u32 %v401_v14, %v313_v15 }
   0x6   :  { %v422_v17 = vld [vmem:[%s604_s3 + $0x78] sm:$0xff]  ;;  %v399_v22 = vld [vmem:[%s602_s1 + $0x4] sm:$0xf]  ;;  %v305_v23 = vld [vmem:[%s602_s1 + $0x8] sm:$0xf0]  ;;  %253 = vmatpush.bf16.msra.mxu2 %v414_v16 }
   0x7   :  { %v413_v24 = vld [vmem:[%s604_s3 + $0x30] sm:$0xff]  ;;  %267 = vmatpush.bf16.msra.mxu3 %v422_v17 }
   0x8   :  { %121 = vmatpush.bf16.msra.mxu0 %v320_v10  ;;  %v421_v25 = vld [vmem:[%s604_s3 + $0x70] sm:$0xff] }
   0x9   :  { %135 = vmatpush.bf16.msra.mxu1 %v324_v11 }
   0xa   :  { %10 = vsyncpa [#allocation3], 0  ;;  %v304_v26 = vor.u32 %v400_v20, %v303_v19  ;;  %v64_v27 = vld [vmem:[%s601_s0] sm:$0xff]  ;;  %v65_v28 = vld [vmem:[%s601_s0 + $0x8] sm:$0xff]  ;;  %v308_v29 = vor.u32 %v399_v22, %v305_v23  ;;  %254 = vmatpush.bf16.msra.mxu2 %v413_v24  ;;  %vm112_vm0 = vcmask 523264   ;;  %s453_s11 = smov [#allocation2]  }
   0xb   :  { %v412_v30 = vld [vmem:[%s604_s3 + $0x28] sm:$0xff]  ;;  %268 = vmatpush.bf16.msra.mxu3 %v421_v25  ;;  %v66_v32 = vpack.c.bf16 %v65_v28, %v64_v27  ;;  %v411_v33 = vld [vmem:[%s604_s3 + $0x20] sm:$0xff]  ;;  %v410_v35 = vld [vmem:[%s604_s3 + $0x18] sm:$0xff]  ;;  %s287_s1 = sshll.u32 %s453_s11, 4  ;;  %s289_s14 = sshll.u32 %s606_s5, 4  ;;  %s288_s1 = int_to_ptr.vmem [resolvable:$true] %s287_s1  ;;  %s290_s14 = int_to_ptr.hbm [resolvable:$true] %s289_s14 }
   0xc   :  { %122 = vmatpush.bf16.msra.mxu0 %v312_v18  ;;  %v420_v31 = vld [vmem:[%s604_s3 + $0x68] sm:$0xff]  ;;  %v419_v34 = vld [vmem:[%s604_s3 + $0x60] sm:$0xff]  ;;  %v418_v36 = vld [vmem:[%s604_s3 + $0x58] sm:$0xff]  ;;  %s455_s15 = smov 8  }
   0xd   :  { %136 = vmatpush.bf16.msra.mxu1 %v316_v21  ;;  %v409_v37 = vld [vmem:[%s604_s3 + $0x10] sm:$0xff]  ;;  %v408_v39 = vld [vmem:[%s604_s3 + $0x8] sm:$0xff]  ;;  %v407_v41 = vld [vmem:[%s604_s3] sm:$0xff] }
   0xe   :  { %255 = vmatpush.bf16.msra.mxu2 %v412_v30  ;;  %v417_v38 = vld [vmem:[%s604_s3 + $0x50] sm:$0xff]  ;;  %v416_v40 = vld [vmem:[%s604_s3 + $0x48] sm:$0xff]  ;;  %v415_v42 = vld [vmem:[%s604_s3 + $0x40] sm:$0xff] }
   0xf   :  { %269 = vmatpush.bf16.msra.mxu3 %v420_v31  ;;  %v30_v43 = vld [vmem:[%s603_s2] sm:$0x3] }
  0x10   :  { %123 = vmatpush.bf16.msra.mxu0 %v304_v26  ;;  %v68_v45 = vperm.slane %v30_v43, 0  ;;  %v69_v47 = vperm.slane %v30_v43, 1  ;;  %v426_v0 = vld [vmem:[%s605_s4] ss:$0 sm:$0xff]  ;;  %s454_s4 = smov 128  }
  0x11   :  { %137 = vmatpush.bf16.msra.mxu1 %v308_v29 }
  0x12   :  { %256 = vmatpush.bf16.msra.mxu2 %v411_v33 }
  0x13   :  { %333 = vmatmul.msk.bf16.vlgmr.msra.gmra.mxu0 %vm112_vm0, %v66_v32  ;;  %270 = vmatpush.bf16.msra.mxu3 %v419_v34 }
  0x14   :  { %334 = vmatmul.msk.bf16.vlgmr.msra.gmra.mxu1 %vm112_vm0, %v66_v32 }
  0x16   :  { %257 = vmatpush.bf16.msra.mxu2 %v410_v35 }
  0x17   :  { %271 = vmatpush.bf16.msra.mxu3 %v418_v36 }
  0x1a   :  { %258 = vmatpush.bf16.msra.mxu2 %v409_v37 }
  0x1b   :  { %272 = vmatpush.bf16.msra.mxu3 %v417_v38 }
  0x1e   :  { %259 = vmatpush.bf16.msra.mxu2 %v408_v39 }
  0x1f   :  { %273 = vmatpush.bf16.msra.mxu3 %v416_v40 }
  0x22   :  { %260 = vmatpush.bf16.msra.mxu2 %v407_v41 }
  0x23   :  { %274 = vmatpush.bf16.msra.mxu3 %v415_v42 }
  0x90   :  { %v125_v44 = vpop.f32.mrf.mxu0 }
  0x91   :  { %v139_v46 = vpop.f32.mrf.mxu1  ;;  %v126_v48 = vadd.f32 %v125_v44, %v68_v45 }
  0x92   :  { %v140_v49 = vadd.f32 %v139_v46, %v69_v47 }
  0x93   :  { %v144_v51 = vmax.f32 %v126_v48, 0.0 }
  0x94   :  { %v145_v54 = vmax.f32 %v140_v49, 0.0 }
  0x95   :  { %v148_v58 = vmul.f32 %v144_v51, %v144_v51 }
  0x96   :  { %v149_v60 = vmul.f32 %v145_v54, %v145_v54 }
  0x98   :  { %v127_v50 = vpop.f32.mrf.mxu0 }
  0x99   :  { %v128_v52 = vadd.f32 %v127_v50, %v68_v45  ;;  %v141_v53 = vpop.f32.mrf.mxu1 }
  0x9a   :  { %v142_v55 = vadd.f32 %v141_v53, %v69_v47 }
  0x9b   :  { %v146_v56 = vmax.f32 %v128_v52, 0.0 }
  0x9c   :  { %v147_v57 = vmax.f32 %v142_v55, 0.0 }
  0x9d   :  { %v150_v59 = vmul.f32 %v146_v56, %v146_v56 }
  0x9e   :  { %v151_v61 = vmul.f32 %v147_v57, %v147_v57 }
  0x9f   :  { %v152_v62 = vpack.c.bf16 %v150_v59, %v148_v58 }
  0xa0   :  { %v153_v63 = vpack.c.bf16 %v151_v61, %v149_v60 }
  0xa1   :  { %261 = vmatmul.bf16.vlgmr.msra.gmra.mxu2 %v152_v62 }
  0xa2   :  { %275 = vmatmul.bf16.vlgmr.msra.gmra.mxu3 %v153_v63 }
 0x124   :  { %v262_v1 = vpop.f32.mrf.mxu2 }
 0x125   :  { %v263_v2 = vadd.f32 %v426_v0, %v262_v1  ;;  %v276_v3 = vpop.f32.mrf.mxu3 }
 0x127   :  { %v277_v4 = vadd.f32 %v276_v3, %v263_v2 }
 0x129   :  { %281 = vst.msk [vmem:[#allocation2] sm:$0xff] %vm112_vm0, %v277_v4 }
 0x12c   :  { %v264_v5 = vpop.f32.mrf.mxu2 }
 0x12d   :  { %v265_v6 = vadd.f32 %v426_v0, %v264_v5  ;;  %v278_v7 = vpop.f32.mrf.mxu3 }
 0x12f   :  { %v279_v8 = vadd.f32 %v278_v7, %v265_v6 }
 0x131   :  { %282 = vst.msk [vmem:[#allocation2 + $0x8] sm:$0xff] %vm112_vm0, %v279_v8 }
 0x132   :  { %295 = dma.vmem_to_hbm [thread:$0]  %s288_s1, 256, %s290_s14, [#allocation3], %s454_s4, %s454_s4, %s455_s15  }
 0x133   :  { %451 = dma.done.wait [#allocation3], 256  }
 0x134   :  { %452 = vsyncadd [#allocation3], 4294967040 }
 0x135   :  { %300 = vsyncpa [#allocation3], 1 }

</bundles_post_ra>
